<compile_context>
chip_gen: v6e
topology: v6e:2x2x1
jax: 0.10.0
libtpu: 0.0.40
codegen_flags: <defaults>
</compile_context>

<pallas_src>
import functools
import math

import numpy as np
import jax
import jax.numpy as jnp
from jax.experimental import pallas as pl
from jax.experimental.pallas import tpu as pltpu

NEG_INF = -1e30


def _round_up(x, m):
    return ((x + m - 1) // m) * m


# --------------------------------------------------------------------------- #
# Kernel 1: fc projection + per-head attention scores (node-row-tiled grid)
# --------------------------------------------------------------------------- #
def _project_kernel(x_ref, wT_ref, s_ref, feat_ref, scores_ref):
    # MXU: bf16 operands, f32 accumulation.  Padded W^T columns are zero, so
    # feat columns [HD:HDp] are exactly zero.
    feat = jnp.dot(x_ref[...], wT_ref[...],
                   preferred_element_type=jnp.float32)            # (tn, HDp) f32
    # el/er for every head in one matmul against the block-diagonal S:
    # scores[:, h] = el_h, scores[:, H+h] = er_h (remaining lanes are zero).
    scores_ref[...] = jnp.dot(feat, s_ref[...],
                              preferred_element_type=jnp.float32)  # (tn, 128)
    # Single lane-dense bf16 store; head split happens once in the wrapper.
    feat_ref[...] = feat.astype(feat_ref.dtype)                    # (tn, HDp)


# --------------------------------------------------------------------------- #
# Kernel 2: masked edge-softmax + raw-score aggregation (dst-tiled grid)
# --------------------------------------------------------------------------- #
def _attention_kernel(feat_ref, el_ref, er_ref, adj_ref, bias_ref,
                      rst_ref, att_ref, *, num_heads, out_feats, negative_slope):
    adj_f = adj_ref[...].astype(jnp.float32)          # (td, Np) from int8 {0,1}
    mask = adj_f > 0.0
    el_all = el_ref[...]                              # (H, Np)  src scores
    er_all = er_ref[...]                              # (td, H)  dst scores

    parts = []
    for h in range(num_heads):
        el_row = el_all[h:h + 1, :]                   # (1, Np)
        er_col = er_all[:, h:h + 1]                   # (td, 1)

        # e_raw[dst, src] = el[src] + er[dst]   (DGL u_add_v)
        e_raw = er_col + el_row                       # (td, Np) f32
        e_act = jnp.where(e_raw >= 0, e_raw, negative_slope * e_raw)  # LeakyReLU

        # edge_softmax over incoming edges of each dst (masked over src lanes)
        e_msk = jnp.where(mask, e_act, NEG_INF)
        m = jnp.max(e_msk, axis=-1, keepdims=True)
        p = jnp.exp(e_msk - m)                        # non-edges -> exactly 0
        denom = jnp.sum(p, axis=-1, keepdims=True)
        inv = pl.reciprocal(denom, approx=True)       # EUP slot, ~free
        att_ref[h] = (p * inv).astype(att_ref.dtype)  # (td, Np) bf16 writeback

        # Aggregation uses the RAW (pre-LeakyReLU) scores -- module quirk.
        w = jnp.where(mask, e_raw, 0.0).astype(jnp.bfloat16)          # bf16 MXU
        parts.append(jnp.dot(w, feat_ref[h],
                             preferred_element_type=jnp.float32))     # (td, D)

    # One lane-dense store of the padded result tile (+ padded bias).
    td = parts[0].shape[0]
    hd = num_heads * out_feats
    lane_pad = rst_ref.shape[-1] - hd
    if lane_pad:
        parts.append(jnp.zeros((td, lane_pad), jnp.float32))
    rst_ref[...] = jnp.concatenate(parts, axis=-1) + bias_ref[...]    # (td, HDp)


# --------------------------------------------------------------------------- #
# Wrapper
# --------------------------------------------------------------------------- #
def gat_forward(x, fc_weight, attn_l, attn_r, bias, adj, *, num_heads, out_feats,
                negative_slope=0.2, tile_nodes=256, tile_dst=256,
                att_dtype=jnp.bfloat16):
    N, f_in = x.shape
    H, D = num_heads, out_feats
    HD = H * D

    # ---- lane/sublane-aligned padded sizes ----------------------------------
    Fp = _round_up(f_in, 128)
    HDp = _round_up(HD, 128)
    SCp = _round_up(2 * H, 128)
    Np = _round_up(N, 128)
    tn = min(_round_up(tile_nodes, 128), Np)
    td = min(_round_up(tile_dst, 128), Np)
    Np = _round_up(Np, int(math.lcm(tn, td)))         # no remainder tiles

    # ---- padded inputs (padding is benign: padded src rows have zero features
    # and no edges; padded dst rows are sliced off afterwards) ----------------
    x_p = jnp.zeros((Np, Fp), jnp.bfloat16).at[:N, :f_in].set(x.astype(jnp.bfloat16))
    wT_p = jnp.zeros((Fp, HDp), jnp.bfloat16).at[:f_in, :HD].set(
        fc_weight.T.astype(jnp.bfloat16))
    bias_p = jnp.zeros((1, HDp), jnp.float32).at[0, :HD].set(
        bias.reshape(-1).astype(jnp.float32))
    adj_p = jnp.zeros((Np, Np), jnp.int8).at[:N, :N].set((adj != 0).astype(jnp.int8))

    # Block-diagonal score matrix: scores = feat @ S gives [el_0..el_{H-1}, er_0..er_{H-1}, 0...]
    al = attn_l.reshape(H, D).astype(jnp.float32)
    ar = attn_r.reshape(H, D).astype(jnp.float32)
    S = jnp.zeros((HDp, SCp), jnp.float32)
    for h in range(H):
        S = S.at[h * D:(h + 1) * D, h].set(al[h])
        S = S.at[h * D:(h + 1) * D, H + h].set(ar[h])

    # ---- kernel 1: projection + scores --------------------------------------
    k1_bytes = 2 * (tn * Fp * 2 + Fp * HDp * 2 + HDp * SCp * 4
                    + tn * HDp * 2 + tn * SCp * 4)
    k1_vmem = int(min(max(2 * k1_bytes + (4 << 20), 32 << 20), 64 << 20))
    feat_flat, scores = pl.pallas_call(
        _project_kernel,
        grid=(Np // tn,),
        in_specs=[
            pl.BlockSpec((tn, Fp), lambda i: (i, 0)),       # x tile (bf16)
            pl.BlockSpec((Fp, HDp), lambda i: (0, 0)),      # W^T (full, bf16)
            pl.BlockSpec((HDp, SCp), lambda i: (0, 0)),     # block-diag S (f32)
        ],
        out_specs=(
            pl.BlockSpec((tn, HDp), lambda i: (i, 0)),      # projected feat (bf16)
            pl.BlockSpec((tn, SCp), lambda i: (i, 0)),      # [el | er | 0] scores
        ),
        out_shape=(jax.ShapeDtypeStruct((Np, HDp), jnp.bfloat16),
                   jax.ShapeDtypeStruct((Np, SCp), jnp.float32)),
        compiler_params=pltpu.CompilerParams(
            dimension_semantics=("parallel",), vmem_limit_bytes=k1_vmem),
    )(x_p, wT_p, S)

    # Cheap XLA layout glue (touches only O(N*HD) bytes): per-head feature slabs
    # for the aggregation matmuls, and src-on-lanes el for the softmax kernel.
    feat_heads = jnp.transpose(feat_flat[:, :HD].reshape(Np, H, D), (1, 0, 2))  # (H, Np, D)
    el_T = scores[:, :H].T                                                      # (H, Np)
    er = scores[:, H:2 * H]                                                      # (Np, H)

    # ---- kernel 2: edge-softmax + aggregation, tiled over dst nodes ---------
    att_bytes = jnp.dtype(att_dtype).itemsize
    k2_bytes = 2 * (H * Np * D * 2 + H * Np * 4 + td * 128 * 4 + td * Np * 1
                    + HDp * 4 + td * HDp * 4 + H * td * Np * att_bytes)
    k2_vmem = int(min(max(2 * k2_bytes + (4 << 20), 32 << 20), 64 << 20))
    attn_fn = functools.partial(_attention_kernel, num_heads=H, out_feats=D,
                                negative_slope=negative_slope)
    rst_pad, att_dense = pl.pallas_call(
        attn_fn,
        grid=(Np // td,),
        in_specs=[
            pl.BlockSpec((H, Np, D), lambda i: (0, 0, 0)),  # per-head feat (full)
            pl.BlockSpec((H, Np), lambda i: (0, 0)),        # el (full, src on lanes)
            pl.BlockSpec((td, H), lambda i: (i, 0)),        # er (dst tile)
            pl.BlockSpec((td, Np), lambda i: (i, 0)),       # adj (dst tile, int8)
            pl.BlockSpec((1, HDp), lambda i: (0, 0)),       # bias (lane-padded)
        ],
        out_specs=(
            pl.BlockSpec((td, HDp), lambda i: (i, 0)),      # rst tile (lane-padded)
            pl.BlockSpec((H, td, Np), lambda i: (0, i, 0)),  # dense attention tile
        ),
        out_shape=(jax.ShapeDtypeStruct((Np, HDp), jnp.float32),
                   jax.ShapeDtypeStruct((H, Np, Np), att_dtype)),
        compiler_params=pltpu.CompilerParams(
            dimension_semantics=("parallel",), vmem_limit_bytes=k2_vmem),
    )(feat_heads, el_T, er, adj_p, bias_p)

    rst = rst_pad[:N, :HD].reshape(N, H, D)                 # (N, H, D_out)
    att = att_dense[:, :N, :N]                              # (H, N_dst, N_src)
    return rst, att


# --------------------------------------------------------------------------- #
# Pure-JAX reference (same semantics; mirrors the kernel's bf16 MXU operands so
# the tolerance check isolates kernel correctness).
# --------------------------------------------------------------------------- #
def gat_reference(x, fc_weight, attn_l, attn_r, bias, adj,
                  *, num_heads, out_feats, negative_slope=0.2):
    N = x.shape[0]
    feat = jnp.dot(x.astype(jnp.bfloat16), fc_weight.T.astype(jnp.bfloat16),
                   preferred_element_type=jnp.float32).reshape(N, num_heads, out_feats)
    al = attn_l.reshape(1, num_heads, out_feats)
    ar = attn_r.reshape(1, num_heads, out_feats)
    el = jnp.sum(feat * al, axis=-1)                        # (N, H) src score
    er = jnp.sum(feat * ar, axis=-1)                        # (N, H) dst score
    e_raw = er[:, None, :] + el[None, :, :]                 # (N_dst, N_src, H)
    e_act = jnp.where(e_raw >= 0, e_raw, negative_slope * e_raw)
    mask = (adj > 0)[:, :, None]
    e_m = jnp.where(mask, e_act, NEG_INF)
    m = jnp.max(e_m, axis=1, keepdims=True)
    p = jnp.exp(e_m - m) * adj[:, :, None]
    a = p / jnp.sum(p, axis=1, keepdims=True)               # (N_dst, N_src, H)
    w = jnp.where(mask, e_raw, 0.0).astype(jnp.bfloat16)    # raw e for aggregation
    rst = jnp.einsum('ijh,jhd->ihd', w, feat.astype(jnp.bfloat16),
                     preferred_element_type=jnp.float32)
    rst = rst + bias.reshape(1, num_heads, out_feats)
    return rst, jnp.transpose(a, (2, 0, 1))                 # (N,H,D), (H,N_dst,N_src)


if __name__ == "__main__":
    # ---- module config: GAT(in_feats, h_feats, out_feats) -> GATConv(in, h, 3)
    N = 8            # number of nodes
    IN_FEATS = 16
    H_FEATS = 8      # out_feats of the GATConv
    NUM_HEADS = 3

    key = jax.random.PRNGKey(0)
    k_x, k_w, k_al, k_ar = jax.random.split(key, 4)

    # node features (N, D_in)
    x = jax.random.normal(k_x, (N, IN_FEATS), dtype=jnp.float32)

    # synthetic graph (src -> dst) with self-loops so no node has 0 in-degree
    src = np.array([0, 1, 2, 3, 2, 5, 6, 7, 4, 1] + list(range(N)), dtype=np.int32)
    dst = np.array([1, 2, 3, 4, 0, 3, 2, 5, 6, 7] + list(range(N)), dtype=np.int32)
    adj_np = np.zeros((N, N), dtype=np.float32)
    adj_np[dst, src] = 1.0                                  # adj[dst, src]
    adj = jnp.asarray(adj_np)

    # ---- deterministic parameter init (xavier-normal-like, gain=sqrt(2)) ----
    gain = float(np.sqrt(2.0))
    std_fc = gain * np.sqrt(2.0 / (IN_FEATS + NUM_HEADS * H_FEATS))
    fc_weight = std_fc * jax.random.normal(k_w, (NUM_HEADS * H_FEATS, IN_FEATS),
                                           dtype=jnp.float32)
    std_attn = gain * np.sqrt(2.0 / (NUM_HEADS * H_FEATS + H_FEATS))
    attn_l = std_attn * jax.random.normal(k_al, (1, NUM_HEADS, H_FEATS), dtype=jnp.float32)
    attn_r = std_attn * jax.random.normal(k_ar, (1, NUM_HEADS, H_FEATS), dtype=jnp.float32)
    bias = jnp.zeros((NUM_HEADS * H_FEATS,), dtype=jnp.float32)  # init.constant_(bias, 0)

    # ---- run Pallas kernels ----
    rst, att_dense = gat_forward(x, fc_weight, attn_l, attn_r, bias, adj,
                                 num_heads=NUM_HEADS, out_feats=H_FEATS)
    rst = jax.block_until_ready(rst)
    att_dense = jax.block_until_ready(att_dense)

    # per-edge attention (E, H, 1), matching GATConv's get_attention=True output
    att_f32 = att_dense.astype(jnp.float32)
    att_edges = jnp.transpose(att_f32[:, dst, src], (1, 0))[..., None]
    att_edges = jax.block_until_ready(att_edges)

    # ---- validate against pure-JAX reference ----
    rst_ref, att_ref = gat_reference(x, fc_weight, attn_l, attn_r, bias, adj,
                                     num_heads=NUM_HEADS, out_feats=H_FEATS)
    # attention is emitted in bf16 with an approx reciprocal; rst uses bf16 MXU
    # operands (mirrored in the reference) -> bf16-level tolerances.
    np.testing.assert_allclose(np.asarray(att_f32), np.asarray(att_ref),
                               rtol=2e-2, atol=2e-2)
    np.testing.assert_allclose(np.asarray(rst), np.asarray(rst_ref),
                               rtol=2e-2, atol=2e-2)

    # attention rows over existing edges should sum to ~1 for every dst/head
    row_sums = np.asarray(jnp.sum(att_f32, axis=-1))
    np.testing.assert_allclose(row_sums, np.ones_like(row_sums), rtol=5e-3, atol=5e-3)

    assert rst.shape == (N, NUM_HEADS, H_FEATS)
    assert att_edges.shape == (src.shape[0], NUM_HEADS, 1)

    print("KERNEL_OK")
</pallas_src>

<mosaic_0001>
module attributes {stable_mosaic.version = 11 : i64} {
  func.func @_project_kernel(%arg0: i32, %arg1: memref<128x128xbf16, #tpu.memory_space<vmem>>, %arg2: memref<128x128xbf16, #tpu.memory_space<vmem>>, %arg3: memref<128x128xf32, #tpu.memory_space<vmem>>, %arg4: memref<128x128xbf16, #tpu.memory_space<vmem>>, %arg5: memref<128x128xf32, #tpu.memory_space<vmem>>) attributes {dimension_semantics = [#tpu.dimension_semantics<parallel>], iteration_bounds = array<i64: 1>, scalar_prefetch = 0 : i64, scratch_operands = 0 : i64, tpu.core_type = #tpu.core_type<tc>, window_params = [{transform_indices = @transform_0, window_bounds = array<i64: 128, 128>}, {pipeline_mode = #tpu.pipeline_mode<synchronous>, transform_indices = @transform_1, window_bounds = array<i64: 128, 128>}, {pipeline_mode = #tpu.pipeline_mode<synchronous>, transform_indices = @transform_2, window_bounds = array<i64: 128, 128>}, {transform_indices = @transform_3, window_bounds = array<i64: 128, 128>}, {transform_indices = @transform_4, window_bounds = array<i64: 128, 128>}]} {
    %c0 = arith.constant 0 : index
    %c0_0 = arith.constant 0 : index
    %0 = vector.load %arg1[%c0, %c0_0] : memref<128x128xbf16, #tpu.memory_space<vmem>>, vector<128x128xbf16>
    %c0_1 = arith.constant 0 : index
    %c0_2 = arith.constant 0 : index
    %1 = vector.load %arg2[%c0_1, %c0_2] : memref<128x128xbf16, #tpu.memory_space<vmem>>, vector<128x128xbf16>
    %cst = arith.constant dense<0.000000e+00> : vector<128x128xf32>
    %2 = tpu.matmul %0, %1, %cst {dimension_numbers = #tpu.dot_dimension_numbers<[1], [0], [0], [1], [0, 0, 1, 1], [], []>} : vector<128x128xbf16>, vector<128x128xbf16>, vector<128x128xf32> -> vector<128x128xf32>
    %c0_3 = arith.constant 0 : index
    %c0_4 = arith.constant 0 : index
    %3 = vector.load %arg3[%c0_3, %c0_4] : memref<128x128xf32, #tpu.memory_space<vmem>>, vector<128x128xf32>
    %cst_5 = arith.constant dense<0.000000e+00> : vector<128x128xf32>
    %4 = tpu.matmul %2, %3, %cst_5 {dimension_numbers = #tpu.dot_dimension_numbers<[1], [0], [0], [1], [0, 0, 1, 1], [], []>} : vector<128x128xf32>, vector<128x128xf32>, vector<128x128xf32> -> vector<128x128xf32>
    %c0_6 = arith.constant 0 : index
    %c0_7 = arith.constant 0 : index
    %5 = vector.load %arg5[%c0_6, %c0_7] : memref<128x128xf32, #tpu.memory_space<vmem>>, vector<128x128xf32>
    tpu.vector_store %arg5[%c0_6, %c0_7], %4 {strides = array<i32>} : memref<128x128xf32, #tpu.memory_space<vmem>>, vector<128x128xf32>,
    %6 = arith.truncf %2 : vector<128x128xf32> to vector<128x128xbf16>
    %c0_8 = arith.constant 0 : index
    %c0_9 = arith.constant 0 : index
    %7 = vector.load %arg4[%c0_8, %c0_9] : memref<128x128xbf16, #tpu.memory_space<vmem>>, vector<128x128xbf16>
    tpu.vector_store %arg4[%c0_8, %c0_9], %6 {strides = array<i32>} : memref<128x128xbf16, #tpu.memory_space<vmem>>, vector<128x128xbf16>,
    return
  }
  func.func @transform_0(%arg0: i32) -> (i32, i32) {
    %c0_i32 = arith.constant 0 : i32
    %c0_i32_0 = arith.constant 0 : i32
    return %arg0, %c0_i32 : i32, i32
  }
  func.func @transform_1(%arg0: i32) -> (i32, i32) {
    %c0_i32 = arith.constant 0 : i32
    %c0_i32_0 = arith.constant 0 : i32
    %c0_i32_1 = arith.constant 0 : i32
    return %c0_i32, %c0_i32_0 : i32, i32
  }
  func.func @transform_2(%arg0: i32) -> (i32, i32) {
    %c0_i32 = arith.constant 0 : i32
    %c0_i32_0 = arith.constant 0 : i32
    %c0_i32_1 = arith.constant 0 : i32
    return %c0_i32, %c0_i32_0 : i32, i32
  }
  func.func @transform_3(%arg0: i32) -> (i32, i32) {
    %c0_i32 = arith.constant 0 : i32
    %c0_i32_0 = arith.constant 0 : i32
    return %arg0, %c0_i32 : i32, i32
  }
  func.func @transform_4(%arg0: i32) -> (i32, i32) {
    %c0_i32 = arith.constant 0 : i32
    %c0_i32_0 = arith.constant 0 : i32
    return %arg0, %c0_i32 : i32, i32
  }
}

</mosaic_0001>

<bundles_post_ra>
// kernel: tpu_custom_call.1
= control target key start
LH: loop header
LB: loop body
LE: loop exit
PB: predicated region body
PF: predicated region fallthrough
CT: control target
= control target key end

     0   :  { %10 = vsyncpa [#allocation3], 0  ;;  %s1004_s0 = inlined_call_operand.hbm [shape: bf16[128,128], index: 0, kind: input, shape index: {}]   ;;  %s1005_s1 = inlined_call_operand.hbm [shape: bf16[128,128], index: 1, kind: input, shape index: {}]   ;;  %s1006_s2 = inlined_call_operand.hbm [shape: f32[128,128], index: 2, kind: input, shape index: {}]   ;;  %s1007_s3 = inlined_call_operand.hbm [shape: bf16[128,128], index: 3, kind: output, shape index: {0}]   ;;  %s1008_s4 = inlined_call_operand.hbm [shape: f32[128,128], index: 4, kind: output, shape index: {1}]  }
   0x1   :  { %11 = vsyncpa [#allocation6], 0 }
   0x2   :  { %12 = vsyncpa [#allocation4], 0 }
   0x3   :  { %13 = vsyncpa [#allocation10], 0  ;;  %s940_s15 = smov [#allocation5]   ;;  %s941_s17 = smov [#allocation2]  }
   0x4   :  { %s31_s16 = sshll.u32 %s940_s15, 4  ;;  %s19_s18 = sshll.u32 %s941_s17, 4  ;;  %s32_s16 = int_to_ptr.vmem [resolvable:$true] %s31_s16  ;;  %s20_s18 = int_to_ptr.vmem [resolvable:$true] %s19_s18 }
   0x5   :  { %s840_s19 = scalar_lea.vmem %s32_s16, 1024  ;;  %p845_p1 = scmp.lt.s32.totalorder %s32_s16, %s32_s16 }
   0x6   :  { %p841_p0 = scmp.ne.s32.totalorder %s32_s16, %s840_s19  ;;  %p846_p2 = scmp.lt.s32.totalorder %s840_s19, %s840_s19 }
   0x8   :  { %p847_p3 = por %p846_p2, %p845_p1 }
   0xa   :  { %p848_p4 = pnand %p847_p3, %p841_p0 }
   0xc   :  { %851 = shalt.err (!%p848_p4)
}
   0xd   :  { %s942_s20 = smov 64   ;;  %s943_s21 = smov 4  }
   0xe   :  { %37 = dma.hbm_to_vmem [thread:$0]  %s1005_s1, 1024, %s32_s16, [#allocation6], %s942_s20, %s942_s20, %s943_s21  }
   0xf   :  { %s860_s24 = scalar_lea.vmem %s20_s18, 1024  ;;  %p865_p6 = scmp.lt.s32.totalorder %s20_s18, %s20_s18 }
  0x10   :  { %p861_p5 = scmp.ne.s32.totalorder %s20_s18, %s860_s24  ;;  %p866_p7 = scmp.lt.s32.totalorder %s860_s24, %s860_s24 }
  0x12   :  { %p867_p8 = por %p866_p7, %p865_p6 }
  0x14   :  { %p868_p9 = pnand %p867_p8, %p861_p5 }
  0x16   :  { %871 = shalt.err (!%p868_p9)
}
  0x17   :  { %25 = dma.hbm_to_vmem [thread:$0]  %s1004_s0, 1024, %s20_s18, [#allocation3], %s942_s20, %s942_s20, %s943_s21  }
  0x18   :  { %s944_s27 = smov [#allocation7]  }
  0x19   :  { %s43_s28 = sshll.u32 %s944_s27, 4  ;;  %s44_s28 = int_to_ptr.vmem [resolvable:$true] %s43_s28 }
  0x1a   :  { %s880_s29 = scalar_lea.vmem %s44_s28, 2048  ;;  %p885_p11 = scmp.lt.s32.totalorder %s44_s28, %s44_s28 }
  0x1b   :  { %p881_p10 = scmp.ne.s32.totalorder %s44_s28, %s880_s29  ;;  %p886_p12 = scmp.lt.s32.totalorder %s880_s29, %s880_s29 }
  0x1d   :  { %p887_p13 = por %p886_p12, %p885_p11 }
  0x1f   :  { %p888_p0 = pnand %p887_p13, %p881_p10 }
  0x21   :  { %891 = shalt.err (!%p888_p0)
}
  0x22   :  { %s945_s1 = smov 128   ;;  %s946_s30 = smov 8  }
  0x23   :  { %49 = dma.hbm_to_vmem [thread:$0]  %s1006_s2, 2048, %s44_s28, [#allocation6], %s945_s1, %s945_s1, %s946_s30  }
  0x24   :  { %932 = dma.done.wait [#allocation3], 1024  }
  0x25   :  { %933 = vsyncadd [#allocation3], 4294966272 }
  0x26   :  { %934 = dma.done.wait [#allocation6], 3072  }
  0x27   :  { %935 = vsyncadd [#allocation6], 4294964224  ;;  %v816_v0 = vld [vmem:[#allocation5 + $0x38] sm:$0xff]   ;;  %v817_v1 = vld [vmem:[#allocation5 + $0x30] sm:$0xff]   ;;  %s947_s0 = smov [#allocation8]  }
  0x28   :  { %719 = vmatprep.subr.bf16.mxu0 %v816_v0  ;;  %v818_v2 = vld [vmem:[#allocation5 + $0x28] sm:$0xff]   ;;  %v819_v3 = vld [vmem:[#allocation5 + $0x20] sm:$0xff]   ;;  %v820_v5 = vld [vmem:[#allocation5 + $0x18] sm:$0xff]   ;;  %s547_s2 = sshll.u32 %s947_s0, 4  ;;  %s548_s2 = int_to_ptr.vmem [resolvable:$true] %s547_s2 }
  0x29   :  { %720 = vmatpush3.bf16.msra.mxu0 %v816_v0  ;;  %v824_v4 = vld [vmem:[#allocation2] sm:$0xff]   ;;  %v821_v6 = vld [vmem:[#allocation5 + $0x10] sm:$0xff]   ;;  %v300_v7 = vld [vmem:[#allocation7 + $0x78] sm:$0xff]  ;;  %s892_s7 = scalar_lea.vmem %s548_s2, 1024  ;;  %p897_p2 = scmp.lt.s32.totalorder %s548_s2, %s548_s2 }
  0x2a   :  { %721 = vmatprep.subr.bf16.mxu0 %v817_v1  ;;  %735 = vmatprep.mubr.bf16.mxu0 %v824_v4  ;;  %v299_v8 = vld [vmem:[#allocation7 + $0x70] sm:$0xff]  ;;  %v298_v9 = vld [vmem:[#allocation7 + $0x68] sm:$0xff]  ;;  %v297_v11 = vld [vmem:[#allocation7 + $0x60] sm:$0xff]  ;;  %p893_p1 = scmp.ne.s32.totalorder %s548_s2, %s892_s7  ;;  %p898_p3 = scmp.lt.s32.totalorder %s892_s7, %s892_s7 }
  0x2b   :  { %751 = vmatprep.subr.mxu1 %v300_v7  ;;  %v822_v10 = vld [vmem:[#allocation5 + $0x8] sm:$0xff]   ;;  %v296_v12 = vld [vmem:[#allocation7 + $0x58] sm:$0xff]  ;;  %v823_v13 = vld [vmem:[#allocation5] sm:$0xff]  }
  0x2c   :  { %752 = vmatpush3.msra.mxu1 %v300_v7  ;;  %v295_v14 = vld [vmem:[#allocation7 + $0x50] sm:$0xff]  ;;  %v294_v15 = vld [vmem:[#allocation7 + $0x48] sm:$0xff]  ;;  %v293_v16 = vld [vmem:[#allocation7 + $0x40] sm:$0xff]  ;;  %p899_p4 = por %p898_p3, %p897_p2 }
  0x2d   :  { %722 = vmatpush3.bf16.msra.mxu0 %v817_v1  ;;  %753 = vmatprep.subr.mxu1 %v299_v8  ;;  %v825_v17 = vld [vmem:[#allocation2 + $0x8] sm:$0xff]   ;;  %v292_v18 = vld [vmem:[#allocation7 + $0x38] sm:$0xff]  ;;  %v826_v19 = vld [vmem:[#allocation2 + $0x10] sm:$0xff]  }
  0x2e   :  { %723 = vmatprep.subr.bf16.mxu0 %v818_v2  ;;  %754 = vmatpush3.msra.mxu1 %v299_v8  ;;  %v291_v20 = vld [vmem:[#allocation7 + $0x30] sm:$0xff]  ;;  %v290_v21 = vld [vmem:[#allocation7 + $0x28] sm:$0xff]  ;;  %v289_v22 = vld [vmem:[#allocation7 + $0x20] sm:$0xff]  ;;  %p900_p5 = pnand %p899_p4, %p893_p1 }
  0x2f   :  { %755 = vmatprep.subr.mxu1 %v298_v9  ;;  %v827_v23 = vld [vmem:[#allocation2 + $0x18] sm:$0xff]   ;;  %v828_v25 = vld [vmem:[#allocation2 + $0x20] sm:$0xff]   ;;  %v829_v26 = vld [vmem:[#allocation2 + $0x28] sm:$0xff]  }
  0x30   :  { %756 = vmatpush3.msra.mxu1 %v298_v9  ;;  %v288_v24 = vld [vmem:[#allocation7 + $0x18] sm:$0xff]  ;;  %v830_v27 = vld [vmem:[#allocation2 + $0x30] sm:$0xff]   ;;  %v286_v30 = vld [vmem:[#allocation7 + $0x8] sm:$0xff] }
  0x31   :  { %724 = vmatpush3.bf16.msra.mxu0 %v818_v2  ;;  %757 = vmatprep.subr.mxu1 %v297_v11  ;;  %v831_v28 = vld [vmem:[#allocation2 + $0x38] sm:$0xff]   ;;  %v287_v29 = vld [vmem:[#allocation7 + $0x10] sm:$0xff]  ;;  %v285_v31 = vld [vmem:[#allocation7] sm:$0xff] }
  0x32   :  { %725 = vmatprep.subr.bf16.mxu0 %v819_v3  ;;  %758 = vmatpush3.msra.mxu1 %v297_v11 }
  0x33   :  { %759 = vmatprep.subr.mxu1 %v296_v12 }
  0x34   :  { %760 = vmatpush3.msra.mxu1 %v296_v12 }
  0x35   :  { %726 = vmatpush3.bf16.msra.mxu0 %v819_v3  ;;  %761 = vmatprep.subr.mxu1 %v295_v14 }
  0x36   :  { %727 = vmatprep.subr.bf16.mxu0 %v820_v5  ;;  %762 = vmatpush3.msra.mxu1 %v295_v14 }
  0x37   :  { %763 = vmatprep.subr.mxu1 %v294_v15 }
  0x38   :  { %764 = vmatpush3.msra.mxu1 %v294_v15 }
  0x39   :  { %728 = vmatpush3.bf16.msra.mxu0 %v820_v5  ;;  %765 = vmatprep.subr.mxu1 %v293_v16 }
  0x3a   :  { %729 = vmatprep.subr.bf16.mxu0 %v821_v6  ;;  %766 = vmatpush3.msra.mxu1 %v293_v16 }
  0x3b   :  { %767 = vmatprep.subr.mxu1 %v292_v18 }
  0x3c   :  { %768 = vmatpush3.msra.mxu1 %v292_v18 }
  0x3d   :  { %730 = vmatpush3.bf16.msra.mxu0 %v821_v6  ;;  %769 = vmatprep.subr.mxu1 %v291_v20 }
  0x3e   :  { %731 = vmatprep.subr.bf16.mxu0 %v822_v10  ;;  %770 = vmatpush3.msra.mxu1 %v291_v20 }
  0x3f   :  { %771 = vmatprep.subr.mxu1 %v290_v21 }
  0x40   :  { %772 = vmatpush3.msra.mxu1 %v290_v21 }
  0x41   :  { %732 = vmatpush3.bf16.msra.mxu0 %v822_v10  ;;  %773 = vmatprep.subr.mxu1 %v289_v22 }
  0x42   :  { %733 = vmatprep.subr.bf16.mxu0 %v823_v13  ;;  %774 = vmatpush3.msra.mxu1 %v289_v22 }
  0x43   :  { %775 = vmatprep.subr.mxu1 %v288_v24 }
  0x44   :  { %776 = vmatpush3.msra.mxu1 %v288_v24 }
  0x45   :  { %734 = vmatpush3.bf16.msra.mxu0 %v823_v13  ;;  %777 = vmatprep.subr.mxu1 %v287_v29 }
  0x46   :  { %778 = vmatpush3.msra.mxu1 %v287_v29 }
  0x47   :  { %779 = vmatprep.subr.mxu1 %v286_v30 }
  0x48   :  { %736 = vmatmul.mubr.bf16.vlgmr.msra.gmra.mxu0 %v825_v17  ;;  %780 = vmatpush3.msra.mxu1 %v286_v30 }
  0x49   :  { %739 = vmatprep.mubr.bf16.mxu0 %v826_v19  ;;  %781 = vmatprep.subr.mxu1 %v285_v31 }
  0x4a   :  { %782 = vmatpush3.msra.mxu1 %v285_v31 }
  0x50   :  { %740 = vmatmul.mubr.bf16.gmra.mxu0 %v827_v23 }
  0x51   :  { %743 = vmatprep.mubr.bf16.mxu0 %v828_v25 }
  0x58   :  { %744 = vmatmul.mubr.bf16.gmra.mxu0 %v829_v26 }
  0x59   :  { %747 = vmatprep.mubr.bf16.mxu0 %v830_v27 }
  0x60   :  { %748 = vmatmul.mubr.bf16.gmra.mxu0 %v831_v28 }
 0x108   :  { %v737_v32 = vpop.f32.mrf.mxu0 }
 0x10a   :  { %v222_v33 = vpop.f32.mrf.mxu0 }
 0x10b   :  { %783 = vmatprep.mubr.f32.mxu1 %v222_v33 }
 0x10c   :  { %v738_v34 = vpop.f32.mrf.mxu0 }
 0x10d   :  { %v632_v35 = vpack.c.bf16 %v738_v34, %v737_v32 }
 0x10e   :  { %v225_v36 = vpop.f32.mrf.mxu0 }
 0x10f   :  { %664 = vst [vmem:[#allocation8 + $0x8] sm:$0xff] %v632_v35   ;;  %v627_v37 = vpack.c.bf16 %v225_v36, %v222_v33  ;;  %784 = vmatmul.mubr.f32.vlgmr.msra.gmra.mxu1 %v225_v36 }
 0x110   :  { %v741_v38 = vpop.f32.mrf.mxu0  ;;  %786 = vmatprep.mubr.f32.mxu1 %v737_v32 }
 0x111   :  { %628 = vst [vmem:[#allocation8] sm:$0xff] %v627_v37  }
 0x112   :  { %v238_v39 = vpop.f32.mrf.mxu0 }
 0x113   :  { %787 = vmatmul.mubr.f32.gmra.mxu1 %v738_v34 }
 0x114   :  { %v742_v40 = vpop.f32.mrf.mxu0  ;;  %789 = vmatprep.mubr.f32.mxu1 %v238_v39 }
 0x115   :  { %v642_v41 = vpack.c.bf16 %v742_v40, %v741_v38 }
 0x116   :  { %v241_v42 = vpop.f32.mrf.mxu0 }
 0x117   :  { %666 = vst [vmem:[#allocation8 + $0x18] sm:$0xff] %v642_v41   ;;  %v637_v43 = vpack.c.bf16 %v241_v42, %v238_v39  ;;  %790 = vmatmul.mubr.f32.gmra.mxu1 %v241_v42 }
 0x118   :  { %v745_v44 = vpop.f32.mrf.mxu0  ;;  %792 = vmatprep.mubr.f32.mxu1 %v741_v38 }
 0x119   :  { %665 = vst [vmem:[#allocation8 + $0x10] sm:$0xff] %v637_v43  }
 0x11a   :  { %v254_v45 = vpop.f32.mrf.mxu0 }
 0x11b   :  { %793 = vmatmul.mubr.f32.gmra.mxu1 %v742_v40 }
 0x11c   :  { %v746_v46 = vpop.f32.mrf.mxu0  ;;  %795 = vmatprep.mubr.f32.mxu1 %v254_v45 }
 0x11d   :  { %v652_v47 = vpack.c.bf16 %v746_v46, %v745_v44 }
 0x11e   :  { %v257_v48 = vpop.f32.mrf.mxu0 }
 0x11f   :  { %668 = vst [vmem:[#allocation8 + $0x28] sm:$0xff] %v652_v47   ;;  %v647_v49 = vpack.c.bf16 %v257_v48, %v254_v45  ;;  %796 = vmatmul.mubr.f32.gmra.mxu1 %v257_v48 }
 0x120   :  { %v749_v50 = vpop.f32.mrf.mxu0  ;;  %798 = vmatprep.mubr.f32.mxu1 %v745_v44 }
 0x121   :  { %667 = vst [vmem:[#allocation8 + $0x20] sm:$0xff] %v647_v49  }
 0x122   :  { %v270_v51 = vpop.f32.mrf.mxu0 }
 0x123   :  { %799 = vmatmul.mubr.f32.gmra.mxu1 %v746_v46 }
 0x124   :  { %v750_v52 = vpop.f32.mrf.mxu0  ;;  %801 = vmatprep.mubr.f32.mxu1 %v270_v51 }
 0x125   :  { %v662_v53 = vpack.c.bf16 %v750_v52, %v749_v50 }
 0x126   :  { %v273_v54 = vpop.f32.mrf.mxu0 }
 0x127   :  { %670 = vst [vmem:[#allocation8 + $0x38] sm:$0xff] %v662_v53   ;;  %v657_v55 = vpack.c.bf16 %v273_v54, %v270_v51  ;;  %802 = vmatmul.mubr.f32.gmra.mxu1 %v273_v54 }
 0x128   :  { %804 = vmatprep.mubr.f32.mxu1 %v749_v50 }
 0x129   :  { %669 = vst [vmem:[#allocation8 + $0x30] sm:$0xff] %v657_v55  }
 0x12b   :  { %805 = vmatmul.mubr.f32.gmra.mxu1 %v750_v52 }
 0x12c   :  { %903 = shalt.err (!%p900_p5)
}
 0x12d   :  { %553 = dma.vmem_to_hbm [thread:$0]  %s548_s2, 1024, %s1007_s3, [#allocation4], %s942_s20, %s942_s20, %s943_s21  }
 0x12e   :  { %s948_s3 = smov [#allocation9]  }
 0x12f   :  { %s559_s10 = sshll.u32 %s948_s3, 4  ;;  %s560_s10 = int_to_ptr.vmem [resolvable:$true] %s559_s10 }
 0x130   :  { %s912_s11 = scalar_lea.vmem %s560_s10, 2048  ;;  %p917_p7 = scmp.lt.s32.totalorder %s560_s10, %s560_s10 }
 0x131   :  { %p913_p6 = scmp.ne.s32.totalorder %s560_s10, %s912_s11  ;;  %p918_p8 = scmp.lt.s32.totalorder %s912_s11, %s912_s11 }
 0x133   :  { %p919_p9 = por %p918_p8, %p917_p7 }
 0x135   :  { %p920_p10 = pnand %p919_p9, %p913_p6 }
 0x1cf   :  { %v785_v56 = vpop.f32.mrf.mxu1 }
 0x1d0   :  { %447 = vst [vmem:[#allocation9 + $0x8] sm:$0xff] %v785_v56 }
 0x1d1   :  { %v367_v57 = vpop.f32.mrf.mxu1 }
 0x1d2   :  { %446 = vst [vmem:[#allocation9] sm:$0xff] %v367_v57 }
 0x1d3   :  { %v788_v58 = vpop.f32.mrf.mxu1 }
 0x1d4   :  { %449 = vst [vmem:[#allocation9 + $0x18] sm:$0xff] %v788_v58 }
 0x1d5   :  { %v377_v59 = vpop.f32.mrf.mxu1 }
 0x1d6   :  { %448 = vst [vmem:[#allocation9 + $0x10] sm:$0xff] %v377_v59 }
 0x1d7   :  { %v791_v60 = vpop.f32.mrf.mxu1 }
 0x1d8   :  { %451 = vst [vmem:[#allocation9 + $0x28] sm:$0xff] %v791_v60 }
 0x1d9   :  { %v387_v61 = vpop.f32.mrf.mxu1 }
 0x1da   :  { %450 = vst [vmem:[#allocation9 + $0x20] sm:$0xff] %v387_v61 }
 0x1db   :  { %v794_v62 = vpop.f32.mrf.mxu1 }
 0x1dc   :  { %453 = vst [vmem:[#allocation9 + $0x38] sm:$0xff] %v794_v62 }
 0x1dd   :  { %v397_v63 = vpop.f32.mrf.mxu1 }
 0x1de   :  { %452 = vst [vmem:[#allocation9 + $0x30] sm:$0xff] %v397_v63 }
 0x1df   :  { %v797_v0 = vpop.f32.mrf.mxu1 }
 0x1e0   :  { %455 = vst [vmem:[#allocation9 + $0x48] sm:$0xff] %v797_v0 }
 0x1e1   :  { %v407_v1 = vpop.f32.mrf.mxu1 }
 0x1e2   :  { %454 = vst [vmem:[#allocation9 + $0x40] sm:$0xff] %v407_v1 }
 0x1e3   :  { %v800_v2 = vpop.f32.mrf.mxu1 }
 0x1e4   :  { %457 = vst [vmem:[#allocation9 + $0x58] sm:$0xff] %v800_v2 }
 0x1e5   :  { %v417_v3 = vpop.f32.mrf.mxu1 }
 0x1e6   :  { %456 = vst [vmem:[#allocation9 + $0x50] sm:$0xff] %v417_v3 }
 0x1e7   :  { %v803_v4 = vpop.f32.mrf.mxu1 }
 0x1e8   :  { %459 = vst [vmem:[#allocation9 + $0x68] sm:$0xff] %v803_v4 }
 0x1e9   :  { %v427_v5 = vpop.f32.mrf.mxu1 }
 0x1ea   :  { %458 = vst [vmem:[#allocation9 + $0x60] sm:$0xff] %v427_v5 }
 0x1eb   :  { %v806_v6 = vpop.f32.mrf.mxu1 }
 0x1ec   :  { %461 = vst [vmem:[#allocation9 + $0x78] sm:$0xff] %v806_v6 }
 0x1ed   :  { %v437_v7 = vpop.f32.mrf.mxu1 }
 0x1ee   :  { %460 = vst [vmem:[#allocation9 + $0x70] sm:$0xff] %v437_v7 }
 0x1ef   :  { %923 = shalt.err (!%p920_p10)
}
 0x1f0   :  { %565 = dma.vmem_to_hbm [thread:$0]  %s560_s10, 2048, %s1008_s4, [#allocation10], %s945_s1, %s945_s1, %s946_s30  }
 0x1f1   :  { %936 = dma.done.wait [#allocation4], 1024  }
 0x1f2   :  { %937 = vsyncadd [#allocation4], 4294966272 }
 0x1f3   :  { %938 = dma.done.wait [#allocation10], 2048  }
 0x1f4   :  { %939 = vsyncadd [#allocation10], 4294965248 }
 0x1f5   :  { %572 = vsyncpa [#allocation3], 1 }
 0x1f6   :  { %573 = vsyncpa [#allocation6], 1 }
 0x1f7   :  { %574 = vsyncpa [#allocation4], 1 }
 0x1f8   :  { %575 = vsyncpa [#allocation10], 1 }

</bundles_post_ra>
